<compile_context>
chip_gen: v6e
topology: v6e:2x2x1
jax: 0.10.0
libtpu: 0.0.40
codegen_flags: <defaults>
</compile_context>

<pallas_src>
import functools

import jax
import jax.numpy as jnp
from jax.experimental import pallas as pl
from jax.experimental.pallas import tpu as pltpu


def _cross_attn_kernel(x_ref, y_ref, wq_ref, wk_ref, wv_ref, wp_ref, bp_ref,
                       o_ref, k_scr, v_scr, *, num_heads, head_dim, tile_n,
                       mask_flag, compute_dtype):
    cdt = compute_dtype
    use_approx_recip = jnp.dtype(cdt) == jnp.dtype(jnp.bfloat16)
    d = head_dim
    L = k_scr.shape[0]

    # Fill the per-batch K/V cache once.  The query-tile axis is "arbitrary"
    # (sequential per core), so the scratch filled at i == 0 is valid for every
    # subsequent query tile of this batch.
    @pl.when(pl.program_id(1) == 0)
    def _():
        y = y_ref[0]                                           # (L, C), compute dtype
        k_scr[...] = jnp.dot(y, wk_ref[...],
                             preferred_element_type=jnp.float32).astype(cdt)
        v_scr[...] = jnp.dot(y, wv_ref[...],
                             preferred_element_type=jnp.float32).astype(cdt)

    x = x_ref[0]                                               # (tile_n, C), compute dtype
    # Softmax scale is folded into Wq on the host.
    q = jnp.dot(x, wq_ref[...],
                preferred_element_type=jnp.float32).astype(cdt)  # (tile_n, C)
    k = k_scr[...]                                             # (L, C)
    v = v_scr[...]                                             # (L, C)

    if mask_flag:
        # TriangularCausalMask: hide positions where col > row (N == L).
        row = (pl.program_id(1) * tile_n
               + jax.lax.broadcasted_iota(jnp.int32, (tile_n, L), 0))
        col = jax.lax.broadcasted_iota(jnp.int32, (tile_n, L), 1)
        causal_mask = col > row
        # TODO(synk): once K/V are streamed over L-tiles, skip key tiles strictly
        # above the diagonal and only mask the diagonal tile.

    # Static head loop (num_heads is a small compile-time constant); static
    # lane slices are free.  Head outputs are collected as values and
    # concatenated once (no masked partial VMEM stores / reload).
    # TODO(synk): for head_dim < MXU width the score matmul under-utilizes the
    # MXU (contraction = head_dim); consider grouping heads for very large L.
    heads = []
    for h in range(num_heads):
        qh = q[:, h * d:(h + 1) * d]                           # (tile_n, d)
        kh = k[:, h * d:(h + 1) * d]                           # (L, d)
        vh = v[:, h * d:(h + 1) * d]                           # (L, d)

        # scores = q_h @ k_h^T without materializing a transpose.
        s = jax.lax.dot_general(
            qh, kh, dimension_numbers=(((1,), (1,)), ((), ())),
            preferred_element_type=jnp.float32)                # (tile_n, L)

        if mask_flag:
            s = jnp.where(causal_mask, jnp.float32(-1e30), s)

        # Numerically stable softmax over the last axis, in f32.
        s = s - jnp.max(s, axis=-1, keepdims=True)
        p = jnp.exp(s)
        denom = jnp.sum(p, axis=-1, keepdims=True)
        if use_approx_recip:
            p = p * pl.reciprocal(denom, approx=True)          # EUP slot, ~free
        else:
            p = p / denom                                      # exact f32 path
        # TODO(synk): attn_drop / proj_drop are identity here (eval-mode dropout).

        oh = jnp.dot(p.astype(cdt), vh,
                     preferred_element_type=jnp.float32)       # (tile_n, d)
        heads.append(oh.astype(cdt))

    cat = jnp.concatenate(heads, axis=-1)                      # (tile_n, C)
    out = jnp.dot(cat, wp_ref[...], preferred_element_type=jnp.float32)
    o_ref[0] = (out + bp_ref[...]).astype(o_ref.dtype)


def _vmem_limit_bytes():
    """Generation-aware VMEM request: leave headroom on 64 MiB (v7x) parts."""
    mib = 1024 * 1024
    cap = None
    try:
        info = pltpu.get_tpu_info()
        cap = getattr(info, "vmem_capacity_bytes", None)
    except Exception:
        cap = None
    if not cap or cap <= 0:
        return 48 * mib                      # safe everywhere
    if cap <= 64 * mib:                      # v7x-class: 64 MiB physical per TC
        return max(32 * mib, min(cap - 12 * mib, 52 * mib))
    return max(48 * mib, min(cap - 24 * mib, 110 * mib))   # v5e/v6e: 128 MiB physical


def _pick_tile_n(N, L, C, *, act_bytes, w_bytes, out_bytes, vmem_limit):
    """Derive the query-tile size from a VMEM budget (bigger tiles amortize the
    ~0.35 us per-step pipeline overhead; budget keeps v7x's 64 MiB honest)."""
    # Resident / per-batch cost (single-buffered weights + bias, K/V scratch,
    # double-buffered y).
    fixed = 4 * C * C * w_bytes + C * 4
    fixed += 2 * L * C * w_bytes
    fixed += 2 * L * C * act_bytes
    # Per-query-row cost: x + out double-buffered, q f32, score/exp f32, proj temps.
    per_row = (2 * C * act_bytes + 2 * C * out_bytes
               + C * 4 + 2 * L * 4 + 2 * C * 4 + C * w_bytes)
    budget = int(vmem_limit * 0.7) - fixed
    rows = max(8, budget // max(per_row, 1))
    tile = max(8, min(512, (rows // 8) * 8))
    # TODO(synk): when even tile_n=8 does not fit (huge L*C), stream K/V over
    # L-tiles with an online (flash-style) softmax instead of holding them resident.
    if N < 8:
        return N                              # full-extent block (exempt from /8 rule)
    if tile >= N:
        return N if N % 8 == 0 else (N // 8) * 8   # cdiv grid masks the tail writes
    return tile


def cross_attention(x, y, wq, wk, wv, wp, bp, *, num_heads,
                    cross_attn_flag=True, mask_flag=False,
                    compute_dtype=jnp.bfloat16):
    """Pallas implementation of CrossAttention.forward (eval mode).

    x: (B, N, C), y: (B, L, C).  wq/wk/wv/wp: (C, C) in nn.Linear (out, in)
    layout (qkv_bias=False); proj bias bp: (C,).
    """
    B, N, C = x.shape
    assert C % num_heads == 0
    d = C // num_heads
    scale = float(d) ** -0.5
    out_dtype = x.dtype

    src = y if cross_attn_flag else x
    L = src.shape[1]
    if mask_flag:
        assert N == L, "mask_flag (TriangularCausalMask) requires N == L"

    # nn.Linear computes in @ W.T; pre-transpose to (in, out).  Fold the softmax
    # scale into Wq (zero in-kernel cost); pre-cast weights AND activations to
    # the compute dtype (halves activation/weight DMA bytes in the bf16 path).
    wq_t = (wq.T * scale).astype(compute_dtype)   # (C, C)
    wk_t = wk.T.astype(compute_dtype)             # (C, C)
    wv_t = wv.T.astype(compute_dtype)             # (C, C)
    wp_t = wp.T.astype(compute_dtype)             # (C, C)
    bp2 = bp.reshape(1, C).astype(jnp.float32)
    x_c = x.astype(compute_dtype)
    y_c = src.astype(compute_dtype)

    wbytes = jnp.dtype(compute_dtype).itemsize
    obytes = jnp.dtype(out_dtype).itemsize

    vmem_limit = _vmem_limit_bytes()
    tile_n = _pick_tile_n(N, L, C, act_bytes=wbytes, w_bytes=wbytes,
                          out_bytes=obytes, vmem_limit=vmem_limit)
    n_tiles = pl.cdiv(N, tile_n)

    kernel = functools.partial(
        _cross_attn_kernel, num_heads=num_heads, head_dim=d, tile_n=tile_n,
        mask_flag=mask_flag, compute_dtype=compute_dtype)

    cost = pl.CostEstimate(
        flops=int(2 * B * (N * C * C + 2 * L * C * C + 2 * N * L * C + N * C * C)),
        transcendentals=int(B * num_heads * N * L),
        bytes_accessed=int(x_c.size * wbytes + y_c.size * wbytes
                           + 4 * C * C * wbytes + B * N * C * obytes),
    )

    weight_spec = lambda: pl.BlockSpec((C, C), lambda b, i: (0, 0),
                                       pipeline_mode=pl.Buffered(1))

    return pl.pallas_call(
        kernel,
        out_shape=jax.ShapeDtypeStruct((B, N, C), out_dtype),
        grid_spec=pltpu.PrefetchScalarGridSpec(
            num_scalar_prefetch=0,
            grid=(B, n_tiles),
            in_specs=[
                pl.BlockSpec((1, tile_n, C), lambda b, i: (b, i, 0)),   # x tile
                pl.BlockSpec((1, L, C), lambda b, i: (b, 0, 0)),        # y (per batch)
                weight_spec(),                                          # Wq^T (resident)
                weight_spec(),                                          # Wk^T (resident)
                weight_spec(),                                          # Wv^T (resident)
                weight_spec(),                                          # Wp^T (resident)
                pl.BlockSpec((1, C), lambda b, i: (0, 0),
                             pipeline_mode=pl.Buffered(1)),             # proj bias
            ],
            out_specs=pl.BlockSpec((1, tile_n, C), lambda b, i: (b, i, 0)),
            scratch_shapes=[
                pltpu.VMEM((L, C), compute_dtype),   # per-batch K cache
                pltpu.VMEM((L, C), compute_dtype),   # per-batch V cache
            ],
        ),
        compiler_params=pltpu.CompilerParams(
            # Query-tile axis must be sequential per core so the i==0 K/V fill
            # is valid for the whole batch; batch axis shards across cores.
            dimension_semantics=("parallel", "arbitrary"),
            vmem_limit_bytes=vmem_limit),
        cost_estimate=cost,
    )(x_c, y_c, wq_t, wk_t, wv_t, wp_t, bp2)


def cross_attention_ref(x, y, wq, wk, wv, wp, bp, *, num_heads,
                        cross_attn_flag=True, mask_flag=False):
    """Plain-JAX reference mirroring the PyTorch forward (eval mode)."""
    B, N, C = x.shape
    d = C // num_heads
    scale = float(d) ** -0.5
    src = y if cross_attn_flag else x
    L = src.shape[1]
    q = (x @ wq.T).reshape(B, N, num_heads, d)
    k = (src @ wk.T).reshape(B, L, num_heads, d)
    v = (src @ wv.T).reshape(B, L, num_heads, d)
    attn = jnp.einsum('bnhd,blhd->bhnl', q, k)
    if mask_flag:
        row = jnp.arange(N)[:, None]
        col = jnp.arange(L)[None, :]
        attn = jnp.where((col > row)[None, None], -jnp.inf, attn)
    attn = jax.nn.softmax(scale * attn, axis=-1)
    out = jnp.einsum('bhnl,blhd->bnhd', attn, v).reshape(B, N, C)
    return out @ wp.T + bp


if __name__ == "__main__":
    B, N, L, C, H = 2, 8, 16, 32, 4   # dim=32, num_heads=4, head_dim=8

    key = jax.random.PRNGKey(0)
    kx, ky, kq, kk, kv, kp, kb = jax.random.split(key, 7)
    x = jax.random.normal(kx, (B, N, C), dtype=jnp.float32)
    y = jax.random.normal(ky, (B, L, C), dtype=jnp.float32)
    # Deterministic "Linear" weights, nn.Linear layout (out, in).
    wq = jax.random.normal(kq, (C, C), dtype=jnp.float32) * 0.05
    wk = jax.random.normal(kk, (C, C), dtype=jnp.float32) * 0.05
    wv = jax.random.normal(kv, (C, C), dtype=jnp.float32) * 0.05
    wp = jax.random.normal(kp, (C, C), dtype=jnp.float32) * 0.05
    bp = jax.random.normal(kb, (C,), dtype=jnp.float32) * 0.05

    # 1) f32 compute path, cross-attention, no mask (tight tolerance).
    out_f32 = cross_attention(x, y, wq, wk, wv, wp, bp, num_heads=H,
                              cross_attn_flag=True, mask_flag=False,
                              compute_dtype=jnp.float32)
    out_f32 = jax.block_until_ready(out_f32)
    ref = cross_attention_ref(x, y, wq, wk, wv, wp, bp, num_heads=H,
                              cross_attn_flag=True, mask_flag=False)
    assert out_f32.shape == (B, N, C)
    assert jnp.allclose(out_f32, ref, atol=1e-4, rtol=1e-4), (
        float(jnp.max(jnp.abs(out_f32 - ref))))

    # 2) bf16 MXU path (default, perf config), looser tolerance.
    out_bf16 = cross_attention(x, y, wq, wk, wv, wp, bp, num_heads=H,
                               cross_attn_flag=True, mask_flag=False,
                               compute_dtype=jnp.bfloat16)
    out_bf16 = jax.block_until_ready(out_bf16)
    assert jnp.allclose(out_bf16, ref, atol=2e-2, rtol=2e-2), (
        float(jnp.max(jnp.abs(out_bf16 - ref))))

    # 3) Masked self-attention (causal), f32 path, N == L.
    out_mask = cross_attention(x, y, wq, wk, wv, wp, bp, num_heads=H,
                               cross_attn_flag=False, mask_flag=True,
                               compute_dtype=jnp.float32)
    out_mask = jax.block_until_ready(out_mask)
    ref_mask = cross_attention_ref(x, y, wq, wk, wv, wp, bp, num_heads=H,
                                   cross_attn_flag=False, mask_flag=True)
    assert jnp.allclose(out_mask, ref_mask, atol=1e-4, rtol=1e-4), (
        float(jnp.max(jnp.abs(out_mask - ref_mask))))

    print("KERNEL_OK")
</pallas_src>

<mosaic_0001>
module attributes {stable_mosaic.version = 11 : i64} {
  func.func @_cross_attn_kernel(%arg0: i32, %arg1: i32, %arg2: memref<1x8x32xf32, #tpu.memory_space<vmem>>, %arg3: memref<1x16x32xf32, #tpu.memory_space<vmem>>, %arg4: memref<32x32xf32, #tpu.memory_space<vmem>>, %arg5: memref<32x32xf32, #tpu.memory_space<vmem>>, %arg6: memref<32x32xf32, #tpu.memory_space<vmem>>, %arg7: memref<32x32xf32, #tpu.memory_space<vmem>>, %arg8: memref<1x32xf32, #tpu.memory_space<vmem>>, %arg9: memref<1x8x32xf32, #tpu.memory_space<vmem>>, %arg10: memref<16x32xf32, #tpu.memory_space<vmem>>, %arg11: memref<16x32xf32, #tpu.memory_space<vmem>>) attributes {dimension_semantics = [#tpu.dimension_semantics<parallel>, #tpu.dimension_semantics<arbitrary>], iteration_bounds = array<i64: 2, 1>, scalar_prefetch = 0 : i64, scratch_operands = 2 : i64, tpu.core_type = #tpu.core_type<tc>, window_params = [{transform_indices = @transform_0, window_bounds = array<i64: 1, 8, 32>}, {transform_indices = @transform_1, window_bounds = array<i64: 1, 16, 32>}, {pipeline_mode = #tpu.pipeline_mode<synchronous>, transform_indices = @transform_2, window_bounds = array<i64: 32, 32>}, {pipeline_mode = #tpu.pipeline_mode<synchronous>, transform_indices = @transform_3, window_bounds = array<i64: 32, 32>}, {pipeline_mode = #tpu.pipeline_mode<synchronous>, transform_indices = @transform_4, window_bounds = array<i64: 32, 32>}, {pipeline_mode = #tpu.pipeline_mode<synchronous>, transform_indices = @transform_5, window_bounds = array<i64: 32, 32>}, {pipeline_mode = #tpu.pipeline_mode<synchronous>, transform_indices = @transform_6, window_bounds = array<i64: 1, 32>}, {transform_indices = @transform_7, window_bounds = array<i64: 1, 8, 32>}]} {
    %c0_i32 = arith.constant 0 : i32
    %0 = arith.cmpi eq, %arg1, %c0_i32 : i32
    %1 = arith.extui %0 : i1 to i32
    %c0_i32_0 = arith.constant 0 : i32
    %2 = arith.cmpi ne, %1, %c0_i32_0 : i32
    scf.if %2 {
      %c0_33 = arith.constant 0 : index
      %c0_34 = arith.constant 0 : index
      %c0_35 = arith.constant 0 : index
      %74 = vector.load %arg3[%c0_33, %c0_34, %c0_35] : memref<1x16x32xf32, #tpu.memory_space<vmem>>, vector<1x16x32xf32>
      %75 = vector.shape_cast %74 : vector<1x16x32xf32> to vector<16x32xf32>
      %c0_36 = arith.constant 0 : index
      %c0_37 = arith.constant 0 : index
      %76 = vector.load %arg5[%c0_36, %c0_37] : memref<32x32xf32, #tpu.memory_space<vmem>>, vector<32x32xf32>
      %cst_38 = arith.constant dense<0.000000e+00> : vector<16x32xf32>
      %77 = tpu.matmul %75, %76, %cst_38 {dimension_numbers = #tpu.dot_dimension_numbers<[1], [0], [0], [1], [0, 0, 1, 1], [], []>} : vector<16x32xf32>, vector<32x32xf32>, vector<16x32xf32> -> vector<16x32xf32>
      %c0_39 = arith.constant 0 : index
      %c0_40 = arith.constant 0 : index
      %78 = vector.load %arg10[%c0_39, %c0_40] : memref<16x32xf32, #tpu.memory_space<vmem>>, vector<16x32xf32>
      tpu.vector_store %arg10[%c0_39, %c0_40], %77 {strides = array<i32>} : memref<16x32xf32, #tpu.memory_space<vmem>>, vector<16x32xf32>,
      %c0_41 = arith.constant 0 : index
      %c0_42 = arith.constant 0 : index
      %79 = vector.load %arg6[%c0_41, %c0_42] : memref<32x32xf32, #tpu.memory_space<vmem>>, vector<32x32xf32>
      %cst_43 = arith.constant dense<0.000000e+00> : vector<16x32xf32>
      %80 = tpu.matmul %75, %79, %cst_43 {dimension_numbers = #tpu.dot_dimension_numbers<[1], [0], [0], [1], [0, 0, 1, 1], [], []>} : vector<16x32xf32>, vector<32x32xf32>, vector<16x32xf32> -> vector<16x32xf32>
      %c0_44 = arith.constant 0 : index
      %c0_45 = arith.constant 0 : index
      %81 = vector.load %arg11[%c0_44, %c0_45] : memref<16x32xf32, #tpu.memory_space<vmem>>, vector<16x32xf32>
      tpu.vector_store %arg11[%c0_44, %c0_45], %80 {strides = array<i32>} : memref<16x32xf32, #tpu.memory_space<vmem>>, vector<16x32xf32>,
    } else {
    }
    %c0 = arith.constant 0 : index
    %c0_1 = arith.constant 0 : index
    %c0_2 = arith.constant 0 : index
    %3 = vector.load %arg2[%c0, %c0_1, %c0_2] : memref<1x8x32xf32, #tpu.memory_space<vmem>>, vector<1x8x32xf32>
    %4 = vector.shape_cast %3 : vector<1x8x32xf32> to vector<8x32xf32>
    %c0_3 = arith.constant 0 : index
    %c0_4 = arith.constant 0 : index
    %5 = vector.load %arg4[%c0_3, %c0_4] : memref<32x32xf32, #tpu.memory_space<vmem>>, vector<32x32xf32>
    %cst = arith.constant dense<0.000000e+00> : vector<8x32xf32>
    %6 = tpu.matmul %4, %5, %cst {dimension_numbers = #tpu.dot_dimension_numbers<[1], [0], [0], [1], [0, 0, 1, 1], [], []>} : vector<8x32xf32>, vector<32x32xf32>, vector<8x32xf32> -> vector<8x32xf32>
    %c0_5 = arith.constant 0 : index
    %c0_6 = arith.constant 0 : index
    %7 = vector.load %arg10[%c0_5, %c0_6] : memref<16x32xf32, #tpu.memory_space<vmem>>, vector<16x32xf32>
    %c0_7 = arith.constant 0 : index
    %c0_8 = arith.constant 0 : index
    %8 = vector.load %arg11[%c0_7, %c0_8] : memref<16x32xf32, #tpu.memory_space<vmem>>, vector<16x32xf32>
    %9 = vector.extract_strided_slice %6 {offsets = [0, 0], sizes = [8, 8], strides = [1, 1]} : vector<8x32xf32> to vector<8x8xf32>
    %10 = vector.extract_strided_slice %7 {offsets = [0, 0], sizes = [16, 8], strides = [1, 1]} : vector<16x32xf32> to vector<16x8xf32>
    %11 = vector.extract_strided_slice %8 {offsets = [0, 0], sizes = [16, 8], strides = [1, 1]} : vector<16x32xf32> to vector<16x8xf32>
    %cst_9 = arith.constant dense<0.000000e+00> : vector<8x16xf32>
    %12 = tpu.matmul %9, %10, %cst_9 {dimension_numbers = #tpu.dot_dimension_numbers<[1], [1], [0], [0], [0, 0, 1, 0], [], []>} : vector<8x8xf32>, vector<16x8xf32>, vector<8x16xf32> -> vector<8x16xf32>
    %cst_10 = arith.constant dense<0xFF800000> : vector<8xf32>
    %13 = vector.multi_reduction <maximumf>, %12, %cst_10 [1] : vector<8x16xf32> to vector<8xf32>
    %14 = vector.shape_cast %13 : vector<8xf32> to vector<8x1xf32>
    %15 = vector.broadcast %14 : vector<8x1xf32> to vector<8x16xf32>
    %16 = arith.subf %12, %15 : vector<8x16xf32>
    %17 = math.exp %16 : vector<8x16xf32>
    %cst_11 = arith.constant dense<0.000000e+00> : vector<8xf32>
    %18 = vector.multi_reduction <add>, %17, %cst_11 [1] : vector<8x16xf32> to vector<8xf32>
    %19 = vector.shape_cast %18 : vector<8xf32> to vector<8x1xf32>
    %20 = vector.broadcast %19 : vector<8x1xf32> to vector<8x16xf32>
    %21 = arith.divf %17, %20 : vector<8x16xf32>
    %cst_12 = arith.constant dense<0.000000e+00> : vector<8x8xf32>
    %22 = tpu.matmul %21, %11, %cst_12 {dimension_numbers = #tpu.dot_dimension_numbers<[1], [0], [0], [1], [0, 0, 1, 1], [], []>} : vector<8x16xf32>, vector<16x8xf32>, vector<8x8xf32> -> vector<8x8xf32>
    %23 = vector.extract_strided_slice %6 {offsets = [0, 8], sizes = [8, 8], strides = [1, 1]} : vector<8x32xf32> to vector<8x8xf32>
    %24 = vector.extract_strided_slice %7 {offsets = [0, 8], sizes = [16, 8], strides = [1, 1]} : vector<16x32xf32> to vector<16x8xf32>
    %25 = vector.extract_strided_slice %8 {offsets = [0, 8], sizes = [16, 8], strides = [1, 1]} : vector<16x32xf32> to vector<16x8xf32>
    %cst_13 = arith.constant dense<0.000000e+00> : vector<8x16xf32>
    %26 = tpu.matmul %23, %24, %cst_13 {dimension_numbers = #tpu.dot_dimension_numbers<[1], [1], [0], [0], [0, 0, 1, 0], [], []>} : vector<8x8xf32>, vector<16x8xf32>, vector<8x16xf32> -> vector<8x16xf32>
    %cst_14 = arith.constant dense<0xFF800000> : vector<8xf32>
    %27 = vector.multi_reduction <maximumf>, %26, %cst_14 [1] : vector<8x16xf32> to vector<8xf32>
    %28 = vector.shape_cast %27 : vector<8xf32> to vector<8x1xf32>
    %29 = vector.broadcast %28 : vector<8x1xf32> to vector<8x16xf32>
    %30 = arith.subf %26, %29 : vector<8x16xf32>
    %31 = math.exp %30 : vector<8x16xf32>
    %cst_15 = arith.constant dense<0.000000e+00> : vector<8xf32>
    %32 = vector.multi_reduction <add>, %31, %cst_15 [1] : vector<8x16xf32> to vector<8xf32>
    %33 = vector.shape_cast %32 : vector<8xf32> to vector<8x1xf32>
    %34 = vector.broadcast %33 : vector<8x1xf32> to vector<8x16xf32>
    %35 = arith.divf %31, %34 : vector<8x16xf32>
    %cst_16 = arith.constant dense<0.000000e+00> : vector<8x8xf32>
    %36 = tpu.matmul %35, %25, %cst_16 {dimension_numbers = #tpu.dot_dimension_numbers<[1], [0], [0], [1], [0, 0, 1, 1], [], []>} : vector<8x16xf32>, vector<16x8xf32>, vector<8x8xf32> -> vector<8x8xf32>
    %37 = vector.extract_strided_slice %6 {offsets = [0, 16], sizes = [8, 8], strides = [1, 1]} : vector<8x32xf32> to vector<8x8xf32>
    %38 = vector.extract_strided_slice %7 {offsets = [0, 16], sizes = [16, 8], strides = [1, 1]} : vector<16x32xf32> to vector<16x8xf32>
    %39 = vector.extract_strided_slice %8 {offsets = [0, 16], sizes = [16, 8], strides = [1, 1]} : vector<16x32xf32> to vector<16x8xf32>
    %cst_17 = arith.constant dense<0.000000e+00> : vector<8x16xf32>
    %40 = tpu.matmul %37, %38, %cst_17 {dimension_numbers = #tpu.dot_dimension_numbers<[1], [1], [0], [0], [0, 0, 1, 0], [], []>} : vector<8x8xf32>, vector<16x8xf32>, vector<8x16xf32> -> vector<8x16xf32>
    %cst_18 = arith.constant dense<0xFF800000> : vector<8xf32>
    %41 = vector.multi_reduction <maximumf>, %40, %cst_18 [1] : vector<8x16xf32> to vector<8xf32>
    %42 = vector.shape_cast %41 : vector<8xf32> to vector<8x1xf32>
    %43 = vector.broadcast %42 : vector<8x1xf32> to vector<8x16xf32>
    %44 = arith.subf %40, %43 : vector<8x16xf32>
    %45 = math.exp %44 : vector<8x16xf32>
    %cst_19 = arith.constant dense<0.000000e+00> : vector<8xf32>
    %46 = vector.multi_reduction <add>, %45, %cst_19 [1] : vector<8x16xf32> to vector<8xf32>
    %47 = vector.shape_cast %46 : vector<8xf32> to vector<8x1xf32>
    %48 = vector.broadcast %47 : vector<8x1xf32> to vector<8x16xf32>
    %49 = arith.divf %45, %48 : vector<8x16xf32>
    %cst_20 = arith.constant dense<0.000000e+00> : vector<8x8xf32>
    %50 = tpu.matmul %49, %39, %cst_20 {dimension_numbers = #tpu.dot_dimension_numbers<[1], [0], [0], [1], [0, 0, 1, 1], [], []>} : vector<8x16xf32>, vector<16x8xf32>, vector<8x8xf32> -> vector<8x8xf32>
    %51 = vector.extract_strided_slice %6 {offsets = [0, 24], sizes = [8, 8], strides = [1, 1]} : vector<8x32xf32> to vector<8x8xf32>
    %52 = vector.extract_strided_slice %7 {offsets = [0, 24], sizes = [16, 8], strides = [1, 1]} : vector<16x32xf32> to vector<16x8xf32>
    %53 = vector.extract_strided_slice %8 {offsets = [0, 24], sizes = [16, 8], strides = [1, 1]} : vector<16x32xf32> to vector<16x8xf32>
    %cst_21 = arith.constant dense<0.000000e+00> : vector<8x16xf32>
    %54 = tpu.matmul %51, %52, %cst_21 {dimension_numbers = #tpu.dot_dimension_numbers<[1], [1], [0], [0], [0, 0, 1, 0], [], []>} : vector<8x8xf32>, vector<16x8xf32>, vector<8x16xf32> -> vector<8x16xf32>
    %cst_22 = arith.constant dense<0xFF800000> : vector<8xf32>
    %55 = vector.multi_reduction <maximumf>, %54, %cst_22 [1] : vector<8x16xf32> to vector<8xf32>
    %56 = vector.shape_cast %55 : vector<8xf32> to vector<8x1xf32>
    %57 = vector.broadcast %56 : vector<8x1xf32> to vector<8x16xf32>
    %58 = arith.subf %54, %57 : vector<8x16xf32>
    %59 = math.exp %58 : vector<8x16xf32>
    %cst_23 = arith.constant dense<0.000000e+00> : vector<8xf32>
    %60 = vector.multi_reduction <add>, %59, %cst_23 [1] : vector<8x16xf32> to vector<8xf32>
    %61 = vector.shape_cast %60 : vector<8xf32> to vector<8x1xf32>
    %62 = vector.broadcast %61 : vector<8x1xf32> to vector<8x16xf32>
    %63 = arith.divf %59, %62 : vector<8x16xf32>
    %cst_24 = arith.constant dense<0.000000e+00> : vector<8x8xf32>
    %64 = tpu.matmul %63, %53, %cst_24 {dimension_numbers = #tpu.dot_dimension_numbers<[1], [0], [0], [1], [0, 0, 1, 1], [], []>} : vector<8x16xf32>, vector<16x8xf32>, vector<8x8xf32> -> vector<8x8xf32>
    %65 = tpu.concatenate %22, %36, %50, %64 in 1 : vector<8x8xf32>, vector<8x8xf32>, vector<8x8xf32>, vector<8x8xf32> -> vector<8x32xf32>
    %c0_25 = arith.constant 0 : index
    %c0_26 = arith.constant 0 : index
    %66 = vector.load %arg7[%c0_25, %c0_26] : memref<32x32xf32, #tpu.memory_space<vmem>>, vector<32x32xf32>
    %cst_27 = arith.constant dense<0.000000e+00> : vector<8x32xf32>
    %67 = tpu.matmul %65, %66, %cst_27 {dimension_numbers = #tpu.dot_dimension_numbers<[1], [0], [0], [1], [0, 0, 1, 1], [], []>} : vector<8x32xf32>, vector<32x32xf32>, vector<8x32xf32> -> vector<8x32xf32>
    %c0_28 = arith.constant 0 : index
    %c0_29 = arith.constant 0 : index
    %68 = vector.load %arg8[%c0_28, %c0_29] : memref<1x32xf32, #tpu.memory_space<vmem>>, vector<1x32xf32>
    %69 = vector.broadcast %68 : vector<1x32xf32> to vector<8x32xf32>
    %70 = arith.addf %67, %69 : vector<8x32xf32>
    %c0_30 = arith.constant 0 : index
    %c0_31 = arith.constant 0 : index
    %c0_32 = arith.constant 0 : index
    %71 = vector.load %arg9[%c0_30, %c0_31, %c0_32] : memref<1x8x32xf32, #tpu.memory_space<vmem>>, vector<1x8x32xf32>
    %72 = vector.shape_cast %71 : vector<1x8x32xf32> to vector<8x32xf32>
    %73 = vector.shape_cast %70 : vector<8x32xf32> to vector<1x8x32xf32>
    tpu.vector_store %arg9[%c0_30, %c0_31, %c0_32], %73 {strides = array<i32>} : memref<1x8x32xf32, #tpu.memory_space<vmem>>, vector<1x8x32xf32>,
    return
  }
  func.func @transform_0(%arg0: i32, %arg1: i32) -> (i32, i32, i32) {
    %c0_i32 = arith.constant 0 : i32
    %c0_i32_0 = arith.constant 0 : i32
    return %arg0, %arg1, %c0_i32 : i32, i32, i32
  }
  func.func @transform_1(%arg0: i32, %arg1: i32) -> (i32, i32, i32) {
    %c0_i32 = arith.constant 0 : i32
    %c0_i32_0 = arith.constant 0 : i32
    %c0_i32_1 = arith.constant 0 : i32
    return %arg0, %c0_i32, %c0_i32_0 : i32, i32, i32
  }
  func.func @transform_2(%arg0: i32, %arg1: i32) -> (i32, i32) {
    %c0_i32 = arith.constant 0 : i32
    %c0_i32_0 = arith.constant 0 : i32
    %c0_i32_1 = arith.constant 0 : i32
    return %c0_i32, %c0_i32_0 : i32, i32
  }
  func.func @transform_3(%arg0: i32, %arg1: i32) -> (i32, i32) {
    %c0_i32 = arith.constant 0 : i32
    %c0_i32_0 = arith.constant 0 : i32
    %c0_i32_1 = arith.constant 0 : i32
    return %c0_i32, %c0_i32_0 : i32, i32
  }
  func.func @transform_4(%arg0: i32, %arg1: i32) -> (i32, i32) {
    %c0_i32 = arith.constant 0 : i32
    %c0_i32_0 = arith.constant 0 : i32
    %c0_i32_1 = arith.constant 0 : i32
    return %c0_i32, %c0_i32_0 : i32, i32
  }
  func.func @transform_5(%arg0: i32, %arg1: i32) -> (i32, i32) {
    %c0_i32 = arith.constant 0 : i32
    %c0_i32_0 = arith.constant 0 : i32
    %c0_i32_1 = arith.constant 0 : i32
    return %c0_i32, %c0_i32_0 : i32, i32
  }
  func.func @transform_6(%arg0: i32, %arg1: i32) -> (i32, i32) {
    %c0_i32 = arith.constant 0 : i32
    %c0_i32_0 = arith.constant 0 : i32
    %c0_i32_1 = arith.constant 0 : i32
    return %c0_i32, %c0_i32_0 : i32, i32
  }
  func.func @transform_7(%arg0: i32, %arg1: i32) -> (i32, i32, i32) {
    %c0_i32 = arith.constant 0 : i32
    %c0_i32_0 = arith.constant 0 : i32
    return %arg0, %arg1, %c0_i32 : i32, i32, i32
  }
}

</mosaic_0001>

<bundles_post_ra>
// kernel: tpu_custom_call.1
= control target key start
LH: loop header
LB: loop body
LE: loop exit
PB: predicated region body
PF: predicated region fallthrough
CT: control target
= control target key end

     0   :  { %s2626_s0 = inlined_call_operand.hbm [shape: f32[2,8,32], index: 0, kind: input, shape index: {}]   ;;  %s2627_s1 = inlined_call_operand.hbm [shape: f32[2,16,32], index: 1, kind: input, shape index: {}]   ;;  %s2628_s2 = inlined_call_operand.hbm [shape: f32[32,32], index: 2, kind: input, shape index: {}]   ;;  %s2629_s3 = inlined_call_operand.hbm [shape: f32[32,32], index: 3, kind: input, shape index: {}]   ;;  %s2630_s4 = inlined_call_operand.hbm [shape: f32[32,32], index: 4, kind: input, shape index: {}]   ;;  %s2631_s5 = inlined_call_operand.hbm [shape: f32[32,32], index: 5, kind: input, shape index: {}]   ;;  %s2632_s6 = inlined_call_operand.vmem [shape: f32[1,32], index: 6, kind: input, shape index: {}]   ;;  %s2633_s7 = inlined_call_operand.hbm [shape: f32[2,8,32], index: 7, kind: output, shape index: {}]  }
   0x1   :  { %2637 = sst [smem:[#allocation23_spill]] %s2626_s0 }
   0x2   :  { %2638 = sst [smem:[#allocation24_spill]] %s2628_s2 }
   0x3   :  { %2639 = sst [smem:[#allocation25_spill]] %s2629_s3 }
   0x4   :  { %2640 = sst [smem:[#allocation26_spill]] %s2630_s4 }
   0x5   :  { %2641 = sst [smem:[#allocation27_spill]] %s2631_s5 }
   0x6   :  { %12 = vsyncpa [#allocation5], 0 }
   0x7   :  { %14 = vsyncpa [#allocation5 + $0x1], 0 }
   0x8   :  { %15 = vsyncpa [#allocation8], 0 }
   0x9   :  { %17 = vsyncpa [#allocation8 + $0x1], 0 }
   0xa   :  { %18 = vsyncpa [#allocation11], 0 }
   0xb   :  { %19 = vsyncpa [#allocation14], 0 }
   0xc   :  { %20 = vsyncpa [#allocation6], 0 }
   0xd   :  { %22 = vsyncpa [#allocation6 + $0x1], 0  ;;  %s2251_s24 = smov 0   ;;  %s2253_s25 = smov 0  }
   0xe   :  { %s2255_s26 = smov 0   ;;  %s2257_s27 = smov 0  }
   0xf   :  { %s2259_s28 = smov 0   ;;  %s2261_s29 = smov 0  }
  0x10 LB: > { %s2282_s30 = sadd.s32 4294967295, %s2192_s29   ;;  %p1609_p0 = scmp.ge.s32.totalorder %s2192_s29, 1  ;;  %s2192_s29 = sphi %s2261_s29, %s28_s29   ;;  %s2188_s28 = sphi %s2259_s28, %s2663_s28   ;;  %s2184_s27 = sphi %s2257_s27, %s2662_s27   ;;  %s2180_s26 = sphi %s2255_s26, %s2661_s26   ;;  %s2176_s25 = sphi %s2253_s25, %s2660_s25   ;;  %s2172_s24 = sphi %s2251_s24, %s2659_s24  }
  0x11   : > { %p63_p1 = scmp.eq.s32.totalorder %s2282_s30, 0  ;;  %p232_p2 = scmp.lt.s32.totalorder %s2192_s29, 3 }
  0x12   : > { %s2194_s9 = smov [#allocation9]   ;;  %s2195_s12 = smov [#allocation10]  }
  0x13   : > { %p2287_p3 = pnand %p1609_p0, %p232_p2  ;;  %s244_s10 = sshll.u32 %s2194_s9, 4  ;;  %s245_s10 = int_to_ptr.vmem [resolvable:$true] %s244_s10 }
  0x14   : > { %s257_s13 = sshll.u32 %s2195_s12, 4  ;;  %s2196_s14 = smov [#allocation12]   ;;  %s258_s13 = int_to_ptr.vmem [resolvable:$true] %s257_s13 }
  0x15   : > { %p1824_p4 = pneg %p2287_p3  ;;  %s270_s15 = sshll.u32 %s2196_s14, 4  ;;  %s271_s15 = int_to_ptr.vmem [resolvable:$true] %s270_s15 }
  0x16   : > { %s1947_s16 = scalar_lea.vmem %s245_s10, 512  ;;  %p1955_p11 = scmp.lt.s32.totalorder %s245_s10, %s245_s10 }
  0x17   : > { %p2296_p6 = pnand %p1824_p4, %p63_p1  ;;  %p1948_p8 = scmp.ne.s32.totalorder %s245_s10, %s1947_s16 }
  0x18   : > { %p1956_p12 = scmp.lt.s32.totalorder %s1947_s16, %s1947_s16 }
  0x19   : > { %p1938_p7 = pneg %p2296_p6 }
  0x1a   : > { %p1957_p13 = por %p1956_p12, %p1955_p11 }
  0x1b   : > { %p1950_p9 = pnand %p1948_p8, %p1938_p7 }
  0x1d   : > { %p1951_p10 = pneg %p1950_p9 }
  0x1f   : > { %p1958_p0 = pnand %p1957_p13, %p1951_p10 }
  0x21   : > { %1961 = shalt.err (!%p1958_p0)
}
  0x22   : > { %s2634_s17 = smov 128   ;;  %s2635_s18 = smov 8  }
  0x23   : > { %s2644_s2 = sld [smem:[#allocation24_spill]]  ;;  %s1973_s21 = scalar_lea.vmem %s258_s13, 512 }
  0x24   : > { %p1974_p2 = scmp.ne.s32.totalorder %s258_s13, %s1973_s21  ;;  %p1981_p9 = scmp.lt.s32.totalorder %s258_s13, %s258_s13 }
  0x25   : > { %p1982_p10 = scmp.lt.s32.totalorder %s1973_s21, %s1973_s21 }
  0x26   : > { %p1976_p4 = pnand %p1974_p2, %p1938_p7 }
  0x27   : > { %p1983_p11 = por %p1982_p10, %p1981_p9 }
  0x28   : > { %p1977_p8 = pneg %p1976_p4 }
  0x29   : > { %1827 = dma.hbm_to_vmem [thread:$0]  (!%p2296_p6), %s2644_s2, 512, %s245_s10, [#allocation8], %s2634_s17, %s2634_s17, %s2635_s18  }
  0x2a   : > { %p1984_p12 = pnand %p1983_p11, %p1977_p8 }
  0x2c   : > { %1987 = shalt.err (!%p1984_p12)
}
  0x2d   : > { %s2645_s3 = sld [smem:[#allocation25_spill]]  ;;  %s1999_s9 = scalar_lea.vmem %s271_s15, 512 }
  0x2e   : > { %p2000_p13 = scmp.ne.s32.totalorder %s271_s15, %s1999_s9  ;;  %p2007_p4 = scmp.lt.s32.totalorder %s271_s15, %s271_s15 }
  0x2f   : > { %p2008_p8 = scmp.lt.s32.totalorder %s1999_s9, %s1999_s9 }
  0x30   : > { %p2002_p0 = pnand %p2000_p13, %p1938_p7 }
  0x31   : > { %p2009_p9 = por %p2008_p8, %p2007_p4 }
  0x32   : > { %p2003_p2 = pneg %p2002_p0 }
  0x33   : > { %1830 = dma.hbm_to_vmem [thread:$0]  (!%p2296_p6), %s2645_s3, 512, %s258_s13, [#allocation11], %s2634_s17, %s2634_s17, %s2635_s18  }
  0x34   : > { %p2010_p10 = pnand %p2009_p9, %p2003_p2 }
  0x36   : > { %2013 = shalt.err (!%p2010_p10)
}
  0x37   : > { %s2646_s4 = sld [smem:[#allocation26_spill]]  ;;  %s2199_s13 = smov [#allocation13]  }
  0x38   : > { %s283_s14 = sshll.u32 %s2199_s13, 4  ;;  %s284_s14 = int_to_ptr.vmem [resolvable:$true] %s283_s14 }
  0x39   : > { %s2025_s16 = scalar_lea.vmem %s284_s14, 512  ;;  %p2033_p0 = scmp.lt.s32.totalorder %s284_s14, %s284_s14 }
  0x3a   : > { %p2026_p11 = scmp.ne.s32.totalorder %s284_s14, %s2025_s16  ;;  %p2034_p2 = scmp.lt.s32.totalorder %s2025_s16, %s2025_s16 }
  0x3c   : > { %p2028_p12 = pnand %p2026_p11, %p1938_p7  ;;  %p2035_p4 = por %p2034_p2, %p2033_p0 }
  0x3d   : > { %1833 = dma.hbm_to_vmem [thread:$0]  (!%p2296_p6), %s2646_s4, 512, %s271_s15, [#allocation11], %s2634_s17, %s2634_s17, %s2635_s18  }
  0x3e   : > { %p2029_p13 = pneg %p2028_p12 }
  0x40   : > { %p2036_p8 = pnand %p2035_p4, %p2029_p13 }
  0x42   : > { %2039 = shalt.err (!%p2036_p8)
}
  0x43   : > { %s2647_s5 = sld [smem:[#allocation27_spill]]  ;;  %s1608_s11 = sadd.s32 4294967294, %s2192_s29  }
  0x44   : > { %s40_s20 = sadd.s32 1, %s2188_s28  ;;  %s49_s21 = sadd.s32 1, %s2180_s26 }
  0x45   : > { %p42_p7 = scmp.ge.s32.totalorder %s40_s20, 2  ;;  %p56_p9 = scmp.ne.s32.totalorder %s2180_s26, %s2176_s25 }
  0x46   : > { %p57_p10 = scmp.eq.s32.totalorder %s2192_s29, 0  ;;  %p62_p12 = scmp.ne.s32.totalorder %s2176_s25, %s2172_s24 }
  0x47   : > { %s2665_s20 = smov (%p42_p7, %s40_s20), 0  ;;  %p225_p4 = scmp.eq.s32.totalorder %s1608_s11, 1 }
  0x48   : > { %2648 = sst [smem:[#allocation22_spill]] %s2665_s20  ;;  %p2354_p11 = por %p57_p10, %p56_p9 }
  0x49   : > { %1836 = dma.hbm_to_vmem [thread:$0]  (!%p2296_p6), %s2647_s5, 512, %s284_s14, [#allocation14], %s2634_s17, %s2634_s17, %s2635_s18  }
  0x4a   : > { %s44_s23 = ssub.s32 %s2188_s28, %s2665_s20  ;;  %p219_p6 = scmp.eq.s32.totalorder %s2282_s30, 1 }
  0x4b   : > { %p47_p13 = scmp.eq.s32.totalorder %s44_s23, 0  ;;  %p2365_p0 = por %p63_p1, %p62_p12 }
  0x4c   : > { %p2369_p2 = por %p219_p6, %p56_p9  ;;  %p2376_p8 = por %p225_p4, %p62_p12 }
  0x4d   : > { %s2374_s12 = scalar_select %p47_p13, %s2180_s26, %s49_s21  }
  0x4e   : > { %p1852_p7 = scmp.lt.s32.totalorder %s2192_s29, 2  ;;  %s300_s14 = sand.u32 1, %s2180_s26  }
  0x4f   : > { %s1616_s16 = sshll.u32 %s2188_s28, 7  ;;  %s1615_s15 = sshll.u32 %s300_s14, 3 }
  0x50   : > { %s2653_s0 = sld [smem:[#allocation23_spill]]  ;;  %s304_s18 = scalar_lea.vmem [#allocation4], %s1615_s15 }
  0x51   : > { %s312_s2 = sshll.u32 %s304_s18, 4  ;;  %p2388_p9 = pnand %p1852_p7, %p2354_p11  ;;  %s313_s2 = int_to_ptr.vmem [resolvable:$true] %s312_s2 }
  0x52   : > { %s1617_s11 = sshll.u32 %s300_s14, 4  ;;  %s301_s21 = scalar_lea.sflag [#allocation5], %s300_s14 }
  0x53   : > { %p2042_p10 = pneg %p2388_p9  ;;  %s2053_s4 = scalar_lea.vmem %s313_s2, 128 }
  0x54   : > { %p2054_p12 = scmp.ne.s32.totalorder %s313_s2, %s2053_s4 }
  0x56   : > { %s310_s17 = scalar_lea.hbm %s2653_s0, %s1616_s16  ;;  %p2056_p6 = pnand %p2054_p12, %p2042_p10 }
  0x57   : > { %s2200_s16 = smov [#allocation4]  }
  0x58   : > { %p2057_p13 = pneg %p2056_p6  ;;  %s2058_s18 = sshll.u32 %s2200_s16, 4  ;;  %s2059_s18 = int_to_ptr.vmem [resolvable:$false] %s2058_s18 }
  0x59   : > { %s2060_s22 = scalar_lea.vmem %s2059_s18, 256  ;;  %p2061_p11 = scmp.lt.s32.totalorder %s313_s2, %s2059_s18 }
  0x5a   : > { %p2062_p4 = scmp.lt.s32.totalorder %s2060_s22, %s2053_s4 }
  0x5c   : > { %p2063_p7 = por %p2062_p4, %p2061_p11 }
  0x5e   : > { %p2064_p5 = pnand %p2063_p7, %p2057_p13 }
  0x60   : > { %2067 = shalt.err (!%p2064_p5)
}
  0x61   : > { %1840 = dma.hbm_to_vmem [thread:$0]  (!%p2388_p9), %s310_s17, 128, %s313_s2, %s301_s21  }
  0x62   : > { %s1655_s14 = sshll.u32 %s2188_s28, 8  ;;  %s323_s15 = scalar_lea.vmem [#allocation7], %s1617_s11 }
  0x63   : > { %s330_s19 = sshll.u32 %s323_s15, 4  ;;  %s319_s23 = sand.u32 1, %s2192_s29   ;;  %s331_s19 = int_to_ptr.vmem [resolvable:$true] %s330_s19 }
  0x64   : > { %s329_s5 = scalar_lea.hbm %s2627_s1, %s1655_s14  ;;  %s320_s18 = scalar_lea.sflag [#allocation8], %s319_s23 }
  0x65   : > { %s2081_s4 = scalar_lea.vmem %s331_s19, 256  ;;  %s2201_s22 = smov [#allocation7]  }
  0x66   : > { %p2082_p12 = scmp.ne.s32.totalorder %s331_s19, %s2081_s4  ;;  %s2086_s20 = sshll.u32 %s2201_s22, 4  ;;  %s2087_s20 = int_to_ptr.vmem [resolvable:$false] %s2086_s20 }
  0x67   : > { %s2088_s2 = scalar_lea.vmem %s2087_s20, 512  ;;  %p2089_p13 = scmp.lt.s32.totalorder %s331_s19, %s2087_s20 }
  0x68   : > { %p2084_p5 = pnand %p2082_p12, %p2042_p10  ;;  %p2090_p11 = scmp.lt.s32.totalorder %s2088_s2, %s2081_s4 }
  0x6a   : > { %p2085_p6 = pneg %p2084_p5  ;;  %p2091_p4 = por %p2090_p11, %p2089_p13 }
  0x6c   : > { %p2092_p7 = pnand %p2091_p4, %p2085_p6 }
  0x6e   : > { %2095 = shalt.err (!%p2092_p7)
}
  0x6f   : > { %s2655_s0 = smov 8   ;;  %s2656_s17 = smov 128  }
  0x70   : > { %1843 = dma.hbm_to_vmem [thread:$0]  (!%p2388_p9), %s329_s5, 256, %s331_s19, %s320_s18, %s2656_s17, %s2656_s17, %s2655_s0  }
  0x71   : > { %342 = sbr.rel (%p2287_p3) target bundleno = 2906 (0xb5a), region = 48  ;;  %s2415_s11 = sand.u32 (!%p2287_p3), 1, %s2176_s25  }
  0x72   : > { %s1621_s20 = sshll.u32 (!%p2287_p3), %s2415_s11, 3  ;;  %s345_s21 = scalar_lea.sflag (!%p2287_p3), [#allocation5], %s2415_s11 }
  0x73   : > { %s2421_s14 = scalar_lea.vmem (!%p2287_p3), [#allocation4], %s1621_s20 }
  0x76   : > { %2147 = dma.done.wait (%p2365_p0), %s345_s21, 128  }
  0x77   : > { %2149 = vsyncadd (%p2365_p0), %s345_s21, 4294967168  ;;  %s353_s3 = sand.u32 1, %s2282_s30   ;;  %s1622_s5 = sshll.u32 %s2415_s11, 4 }
  0x78   : > { %s354_s8 = scalar_lea.sflag [#allocation8], %s353_s3  ;;  %s357_s15 = scalar_lea.vmem [#allocation7], %s1622_s5 }
  0x79   : > { %2151 = dma.done.wait (%p2365_p0), %s354_s8, 256  }
  0x7a   : > { %2153 = vsyncadd (%p2365_p0), %s354_s8, 4294967040 }
  0x7b   : > { %2155 = dma.done.wait (%p63_p1), [#allocation8], 512  }
  0x7c   : > { %2157 = vsyncadd (%p63_p1), [#allocation8], 4294966784 }
  0x7d   : > { %2159 = dma.done.wait (%p63_p1), [#allocation11], 1024  }
  0x7e   : > { %2161 = vsyncadd (%p63_p1), [#allocation11], 4294966272 }
  0x7f   : > { %2163 = dma.done.wait (%p63_p1), [#allocation14], 512  }
  0x80   : > { %2165 = vsyncadd (%p63_p1), [#allocation14], 4294966784  ;;  %vm419_vm0 = vcmask 261120   ;;  %v418_v0 = vld [vmem:[#allocation10 + $0x18] sm:$0xff]  ;;  %v417_v1 = vld [vmem:[#allocation10 + $0x10] sm:$0xff]  ;;  %v2202_v8 = vmov 0.0  }
  0x81   : > { %1702 = vmatprep.subr.mxu0 %v418_v0  ;;  %v413_v2 = vld [vmem:[%s357_s15] sm:$0xff]  ;;  %v416_v3 = vld [vmem:[#allocation10 + $0x8] sm:$0xff]  ;;  %v506_v4 = vld [vmem:[#allocation12 + $0x18] sm:$0xff]  ;;  %vm2203_vm1 = vmmov 0   ;;  %vm667_vm2 = vcmask 64512   ;;  %s2204_s30 = smov 120  }
  0x82   : > { %1703 = vmatpush3.msra.mxu0 %v418_v0  ;;  %1710 = vmatprep.mubr.msk.f32.mxu0 %vm419_vm0, %v413_v2  ;;  %v415_v5 = vld [vmem:[#allocation10] sm:$0xff]  ;;  %v414_v6 = vld [vmem:[%s357_s15 + $0x8] sm:$0xff]  ;;  %v587_v9 = vld [vmem:[#allocation9 + $0x10] sm:$0xff]  ;;  %vm747_vm3 = vcmask 130048   ;;  %s2205_s9 = smov 112   ;;  %s2206_s19 = smov 104  }
  0x83   : > { %1704 = vmatprep.subr.mxu0 %v417_v1  ;;  %1721 = vmatprep.mubr.msk.f32.mxu1 %vm419_vm0, %v413_v2  ;;  %v588_v7 = vld [vmem:[#allocation9 + $0x18] sm:$0xff]  ;;  %v586_v10 = vld [vmem:[#allocation9 + $0x8] sm:$0xff]  ;;  %v585_v11 = vld [vmem:[#allocation9] sm:$0xff]  ;;  %s2207_s23 = smov 8   ;;  %s2208_s16 = smov 16   ;;  %vm1364_vm4 = vcmask 195584  }
  0x84   : > { %1705 = vmatpush3.msra.mxu0 %v417_v1  ;;  %1713 = vmatprep.subr.mxu1 %v506_v4  ;;  %v584_v12 = vld [vmem:[%s2421_s14] sm:$0xff]  ;;  %v504_v14 = vld [vmem:[#allocation12 + $0x8] sm:$0xff]  ;;  %v503_v15 = vld [vmem:[#allocation12] sm:$0xff]  ;;  %s2209_s18 = smov 24   ;;  %s1652_s2 = sshll.u32 %s2184_s27, 7 }
  0x85   : > { %1706 = vmatprep.subr.mxu0 %v416_v3  ;;  %1714 = vmatpush3.msra.mxu1 %v506_v4  ;;  %v505_v13 = vld [vmem:[#allocation12 + $0x10] sm:$0xff]  ;;  %s408_s0 = scalar_lea.vmem [#allocation15], %s1621_s20  ;;  %s2583_s3 = scalar_lea.hbm %s2633_s7, %s1652_s2 }
  0x86   : > { %1707 = vmatpush3.msra.mxu0 %v416_v3  ;;  %1715 = vmatprep.subr.mxu1 %v505_v13  ;;  %s1466_s17 = sshll.u32 %s408_s0, 4  ;;  %s1452_s5 = scalar_lea.sflag [#allocation6], %s2415_s11  ;;  %s1467_s17 = int_to_ptr.vmem [resolvable:$true] %s1466_s17 }
  0x87   : > { %1708 = vmatprep.subr.mxu0 %v415_v5  ;;  %1716 = vmatpush3.msra.mxu1 %v505_v13  ;;  %s2096_s8 = scalar_lea.vmem %s1467_s17, 128  ;;  %s2210_s27 = smov [#allocation15]  }
  0x88   : > { %1709 = vmatpush3.msra.mxu0 %v415_v5  ;;  %1717 = vmatprep.subr.mxu1 %v504_v14  ;;  %p2097_p1 = scmp.ne.s32.totalorder %s1467_s17, %s2096_s8  ;;  %s2100_s20 = sshll.u32 %s2210_s27, 4  ;;  %s2101_s20 = int_to_ptr.vmem [resolvable:$false] %s2100_s20 }
  0x89   : > { %1711 = vmatmul.mubr.msk.f32.vlgmr.msra.gmra.mxu0 %vm419_vm0, %v414_v6  ;;  %1724 = vmatprep.subr.mxu0 %v2202_v8  ;;  %s2102_s15 = scalar_lea.vmem %s2101_s20, 256  ;;  %p2103_p9 = scmp.lt.s32.totalorder %s1467_s17, %s2101_s20 }
  0x8a   : > { %1725 = vmatpush3.msra.mxu0 %v588_v7  ;;  %1732 = vmatprep.mubr.msk.f32.mxu0 %vm2203_vm1, %v2202_v8  ;;  %p2098_p3 = pnand %p2097_p1, %p2369_p2  ;;  %p2104_p10 = scmp.lt.s32.totalorder %s2102_s15, %s2096_s8 }
  0x8b   : > { %1726 = vmatprep.subr.mxu0 %v2202_v8  ;;  %1718 = vmatpush3.msra.mxu1 %v504_v14 }
  0x8c   : > { %1727 = vmatpush3.msra.mxu0 %v587_v9  ;;  %1719 = vmatprep.subr.mxu1 %v503_v15  ;;  %p2099_p0 = pneg %p2098_p3  ;;  %p2105_p12 = por %p2104_p10, %p2103_p9 }
  0x8d   : > { %1728 = vmatprep.subr.mxu0 %v2202_v8  ;;  %1720 = vmatpush3.msra.mxu1 %v503_v15 }
  0x8e   : > { %1729 = vmatpush3.msra.mxu0 %v586_v10  ;;  %1722 = vmatmul.mubr.msk.f32.vlgmr.msra.gmra.mxu1 %vm419_vm0, %v414_v6  ;;  %p2106_p5 = pnand %p2105_p12, %p2099_p0 }
  0x8f   : > { %1730 = vmatprep.subr.mxu0 %v2202_v8  ;;  %1735 = vmatprep.subr.mxu1 %v2202_v8 }
  0x90   : > { %1731 = vmatpush3.msra.mxu0 %v585_v11  ;;  %1739 = vmatprep.mubr.msk.f32.mxu1 %vm2203_vm1, %v2202_v8 }
  0x91   : > { %1733 = vmatmul.mubr.msk.f32.vlgmr.msra.gmra.mxu0 %vm419_vm0, %v584_v12  ;;  %1756 = vmatprep.subr.mxu0 %v2202_v8 }
  0x92   : > { %1760 = vmatprep.mubr.msk.f32.mxu0 %vm2203_vm1, %v2202_v8 }
 0x149   : > { %v1712_v16 = vpop.f32.mrf.mxu0 }
 0x14a   : > { %502 = vst.msk [vmem:[#allocation2 + $0x8] sm:$0xff] %vm419_vm0, %v1712_v16 }
 0x14b   : > { %v492_v17 = vpop.f32.mrf.mxu0 }
 0x14c   : > { %501 = vst.msk [vmem:[#allocation2] sm:$0xff] %vm419_vm0, %v492_v17 }
 0x14e   : > { %v1723_v22 = vpop.f32.mrf.mxu1 }
 0x14f   : > { %583 = vst.msk [vmem:[#allocation3 + $0x8] sm:$0xff] %vm419_vm0, %v1723_v22 }
 0x150   : > { %v573_v23 = vpop.f32.mrf.mxu1 }
 0x151   : > { %v2465_v18 = vld [vmem:[#allocation2 + $0x8] sm:$0xff]  ;;  %v2467_v19 = vpop.f32.mrf.mxu0  ;;  %582 = vst.msk [vmem:[#allocation3] sm:$0xff] %vm419_vm0, %v573_v23 }
 0x152   : > { %836 = vrot.lane.b32.xlu1 %v2465_v18, %s2204_s30  ;;  %1736 = vmatpush3.xpose.msk.msra.mxu1 %vm667_vm2, %v2465_v18 }
 0x153   : > { %1737 = vmatprep.subr.mxu1 %v2202_v8  ;;  %v1734_v20 = vpop.f32.mrf.mxu0  ;;  %v2474_v21 = vld [vmem:[#allocation2] sm:$0xff] }
 0x156   : > { %834 = vrot.lane.b32.xlu1 %v2474_v21, %s2204_s30  ;;  %1738 = vmatpush3.xpose.msk.msra.mxu1 %vm667_vm2, %v2474_v21  ;;  %v2487_v24 = vld [vmem:[#allocation3 + $0x8] sm:$0xff] }
 0x157   : > { %1742 = vmatprep.subr.mxu1 %v2202_v8 }
 0x158   : > { %v2491_v25 = vld [vmem:[#allocation3] sm:$0xff] }
 0x159   : > { %1740 = vmatmul.mubr.msk.f32.vlgmr.msra.gmra.mxu1 %vm667_vm2, %v2467_v19 }
 0x15a   : > { %1746 = vmatprep.mubr.msk.f32.mxu1 %vm2203_vm1, %v2202_v8  ;;  %1743 = vmatpush3.msra.mxu1 %v2487_v24 }
 0x15b   : > { %1744 = vmatprep.subr.mxu1 %v2202_v8 }
 0x15c   : > { %1745 = vmatpush3.msra.mxu1 %v2491_v25 }
 0x15d   : > { %1749 = vmatprep.subr.mxu1 %v2202_v8 }
 0x1c4   : > { %v837_v36 = vpop.permute.xlu1 %836 }
 0x1c8   : > { %v835_v38 = vpop.permute.xlu1 %834 }
 0x219   : > { %v743_v26 = vpop.f32.mrf.mxu1 }
 0x21a   : > { %v748_v27 = vsel %vm747_vm3, %v743_v26, -inf }
 0x21b   : > { %749 = vmax.xlane.f32.xlu0 %v748_v27  ;;  %v1741_v28 = vpop.f32.mrf.mxu1 }
 0x2a4   : > { %v750_v29 = vpop.xlane.xlu0 %749 }
 0x2a5   : > { %v751_v30 = vsub.f32 %v743_v26, %v750_v29  ;;  %v1369_v29 = vld [vmem:[#allocation13 + $0x18] sm:$0xff] }
 0x2a7   : > { %v752_v31 = vmul.f32 1.442695, %v751_v30  ;;  %v1368_v30 = vld [vmem:[#allocation13 + $0x10] sm:$0xff] }
 0x2a9   : > { %1920 = vpow2.f32 %v752_v31  ;;  %v1366_v31 = vld [vmem:[#allocation13] sm:$0xff] }
 0x2b6   : > { %v1921_v32 = vpop.eup %1920 }
 0x2b7   : > { %v754_v33 = vsel %vm747_vm3, %v1921_v32, 0.0 }
 0x2b8   : > { %755 = vadd.xlane.f32.xlu0 %v754_v33 }
 0x2ce   : > { %832 = vrot.lane.b32.xlu0 %v2467_v19, %s2204_s30 }
 0x341   : > { %v756_v34 = vpop.xlane.xlu0 %755 }
 0x342   : > { %1922 = vrcp.f32 %v756_v34 }
 0x345   : > { %v833_v39 = vpop.permute.xlu0 %832 }
 0x34f   : > { %v1923_v35 = vpop.eup %1922 }
 0x350   : > { %v758_v37 = vmul.f32 %v1923_v35, %v1921_v32 }
 0x352   : > { %1747 = vmatmul.mubr.msk.f32.vlgmr.msra.gmra.mxu1 %vm747_vm3, %v758_v37 }
 0x353   : > { %1750 = vmatpush3.xpose.msk.msra.mxu1 %vm667_vm2, %v837_v36  ;;  %1753 = vmatprep.mubr.msk.f32.mxu1 %vm2203_vm1, %v2202_v8 }
 0x354   : > { %1751 = vmatprep.subr.mxu1 %v2202_v8 }
 0x357   : > { %1752 = vmatpush3.xpose.msk.msra.mxu1 %vm667_vm2, %v835_v38 }
 0x358   : > { %1770 = vmatprep.subr.mxu1 %v2202_v8 }
 0x35a   : > { %1754 = vmatmul.mubr.msk.f32.vlgmr.msra.gmra.mxu1 %vm667_vm2, %v833_v39  ;;  %v1649_v39 = vld [vmem:[%s2632_s6] ss:$0 sm:$0xff] }
 0x35b   : > { %1774 = vmatprep.mubr.msk.f32.mxu1 %vm2203_vm1, %v2202_v8 }
 0x412   : > { %v2509_v40 = vpop.f32.mrf.mxu1 }
 0x414   : > { %v1748_v41 = vpop.f32.mrf.mxu1 }
 0x41a   : > { %v910_v42 = vpop.f32.mrf.mxu1 }
 0x41b   : > { %v914_v43 = vsel %vm747_vm3, %v910_v42, -inf }
 0x41c   : > { %915 = vmax.xlane.f32.xlu1 %v914_v43  ;;  %v1755_v44 = vpop.f32.mrf.mxu1 }
 0x42d   : > { %929 = vrot.lane.b32.xlu1 %v2487_v24, %s2204_s30 }
 0x431   : > { %1010 = vrot.lane.b32.xlu1 %v2465_v18, %s2205_s9 }
 0x435   : > { %1008 = vrot.lane.b32.xlu1 %v2474_v21, %s2205_s9 }
 0x439   : > { %1006 = vrot.lane.b32.xlu1 %v2467_v19, %s2205_s9 }
 0x4a5   : > { %v916_v45 = vpop.xlane.xlu1 %915 }
 0x4a6   : > { %v917_v46 = vsub.f32 %v910_v42, %v916_v45 }
 0x4a8   : > { %v918_v47 = vmul.f32 1.442695, %v917_v46 }
 0x4a9   : > { %v930_v48 = vpop.permute.xlu1 %929 }
 0x4aa   : > { %1924 = vpow2.f32 %v918_v47  ;;  %1757 = vmatpush3.msra.mxu0 %v930_v48 }
 0x4ab   : > { %1758 = vmatprep.subr.mxu0 %v2202_v8 }
 0x4ad   : > { %v1011_v53 = vpop.permute.xlu1 %1010 }
 0x4b1   : > { %v1009_v56 = vpop.permute.xlu1 %1008 }
 0x4b5   : > { %v1007_v57 = vpop.permute.xlu1 %1006 }
 0x4b7   : > { %v1925_v49 = vpop.eup %1924 }
 0x4b8   : > { %v920_v50 = vsel %vm747_vm3, %v1925_v49, 0.0 }
 0x4b9   : > { %921 = vadd.xlane.f32.xlu0 %v920_v50 }
 0x4cf   : > { %927 = vrot.lane.b32.xlu0 %v2491_v25, %s2204_s30 }
 0x542   : > { %v922_v51 = vpop.xlane.xlu0 %921 }
 0x543   : > { %1926 = vrcp.f32 %v922_v51 }
 0x546   : > { %v928_v52 = vpop.permute.xlu0 %927 }
 0x547   : > { %1759 = vmatpush3.msra.mxu0 %v928_v52 }
 0x548   : > { %1763 = vmatprep.subr.mxu0 %v2202_v8 }
 0x550   : > { %v1927_v54 = vpop.eup %1926 }
 0x551   : > { %v924_v55 = vmul.f32 %v1927_v54, %v1925_v49 }
 0x553   : > { %1761 = vmatmul.mubr.msk.f32.vlgmr.msra.gmra.mxu0 %vm747_vm3, %v924_v55 }
 0x554   : > { %1764 = vmatpush3.xpose.msk.msra.mxu0 %vm667_vm2, %v1011_v53  ;;  %1767 = vmatprep.mubr.msk.f32.mxu0 %vm2203_vm1, %v2202_v8 }
 0x555   : > { %1765 = vmatprep.subr.mxu0 %v2202_v8 }
 0x558   : > { %1766 = vmatpush3.xpose.msk.msra.mxu0 %vm667_vm2, %v1009_v56 }
 0x559   : > { %1784 = vmatprep.subr.mxu0 %v2202_v8 }
 0x55b   : > { %1768 = vmatmul.mubr.msk.f32.vlgmr.msra.gmra.mxu0 %vm667_vm2, %v1007_v57 }
 0x55c   : > { %1788 = vmatprep.mubr.msk.f32.mxu0 %vm2203_vm1, %v2202_v8 }
 0x613   : > { %v1002_v58 = vpop.f32.mrf.mxu0 }
 0x615   : > { %v1762_v59 = vpop.f32.mrf.mxu0 }
 0x61b   : > { %v1084_v60 = vpop.f32.mrf.mxu0 }
 0x61c   : > { %v1088_v61 = vsel %vm747_vm3, %v1084_v60, -inf }
 0x61d   : > { %1089 = vmax.xlane.f32.xlu1 %v1088_v61  ;;  %v1769_v62 = vpop.f32.mrf.mxu0 }
 0x62e   : > { %1101 = vrot.lane.b32.xlu1 %v2487_v24, %s2205_s9 }
 0x632   : > { %1182 = vrot.lane.b32.xlu1 %v2465_v18, %s2206_s19 }
 0x636   : > { %1180 = vrot.lane.b32.xlu1 %v2474_v21, %s2206_s19 }
 0x63a   : > { %1178 = vrot.lane.b32.xlu1 %v2467_v19, %s2206_s19 }
 0x6a6   : > { %v1090_v63 = vpop.xlane.xlu1 %1089 }
 0x6a7   : > { %v1091_v0 = vsub.f32 %v1084_v60, %v1090_v63 }
 0x6a9   : > { %v1092_v1 = vmul.f32 1.442695, %v1091_v0 }
 0x6aa   : > { %v1102_v2 = vpop.permute.xlu1 %1101 }
 0x6ab   : > { %1928 = vpow2.f32 %v1092_v1  ;;  %1771 = vmatpush3.msra.mxu1 %v1102_v2 }
 0x6ac   : > { %1772 = vmatprep.subr.mxu1 %v2202_v8 }
 0x6ae   : > { %v1183_v7 = vpop.permute.xlu1 %1182 }
 0x6b2   : > { %v1181_v11 = vpop.permute.xlu1 %1180 }
 0x6b6   : > { %v1179_v12 = vpop.permute.xlu1 %1178 }
 0x6b8   : > { %v1929_v3 = vpop.eup %1928 }
 0x6b9   : > { %v1094_v4 = vsel %vm747_vm3, %v1929_v3, 0.0 }
 0x6ba   : > { %1095 = vadd.xlane.f32.xlu0 %v1094_v4 }
 0x6d0   : > { %1099 = vrot.lane.b32.xlu0 %v2491_v25, %s2205_s9 }
 0x743   : > { %v1096_v5 = vpop.xlane.xlu0 %1095 }
 0x744   : > { %1930 = vrcp.f32 %v1096_v5 }
 0x747   : > { %v1100_v6 = vpop.permute.xlu0 %1099 }
 0x748   : > { %1773 = vmatpush3.msra.mxu1 %v1100_v6 }
 0x749   : > { %1777 = vmatprep.subr.mxu1 %v2202_v8 }
 0x751   : > { %v1931_v9 = vpop.eup %1930 }
 0x752   : > { %v1098_v10 = vmul.f32 %v1931_v9, %v1929_v3 }
 0x754   : > { %1775 = vmatmul.mubr.msk.f32.vlgmr.msra.gmra.mxu1 %vm747_vm3, %v1098_v10 }
 0x755   : > { %1778 = vmatpush3.xpose.msk.msra.mxu1 %vm667_vm2, %v1183_v7  ;;  %1781 = vmatprep.mubr.msk.f32.mxu1 %vm2203_vm1, %v2202_v8 }
 0x756   : > { %1779 = vmatprep.subr.mxu1 %v2202_v8 }
 0x759   : > { %1780 = vmatpush3.xpose.msk.msra.mxu1 %vm667_vm2, %v1181_v11 }
 0x75c   : > { %1782 = vmatmul.mubr.msk.f32.vlgmr.msra.gmra.mxu1 %vm667_vm2, %v1179_v12 }
 0x814   : > { %v1174_v13 = vpop.f32.mrf.mxu1 }
 0x816   : > { %v1776_v14 = vpop.f32.mrf.mxu1 }
 0x81c   : > { %v1256_v15 = vpop.f32.mrf.mxu1 }
 0x81d   : > { %v1260_v16 = vsel %vm747_vm3, %v1256_v15, -inf }
 0x81e   : > { %1261 = vmax.xlane.f32.xlu0 %v1260_v16  ;;  %v1783_v17 = vpop.f32.mrf.mxu1 }
 0x834   : > { %1273 = vrot.lane.b32.xlu0 %v2487_v24, %s2206_s19 }
 0x838   : > { %1351 = vrot.lane.b32.xlu0 %v1002_v58, %s2207_s23 }
 0x8a7   : > { %v1262_v18 = vpop.xlane.xlu0 %1261 }
 0x8a8   : > { %v1263_v19 = vsub.f32 %v1256_v15, %v1262_v18 }
 0x8aa   : > { %v1264_v20 = vmul.f32 1.442695, %v1263_v19 }
 0x8ab   : > { %v1274_v21 = vpop.permute.xlu0 %1273 }
 0x8ac   : > { %1932 = vpow2.f32 %v1264_v20  ;;  %1785 = vmatpush3.msra.mxu0 %v1274_v21 }
 0x8ad   : > { %1786 = vmatprep.subr.mxu0 %v2202_v8 }
 0x8af   : > { %v1352_v34 = vpop.permute.xlu0 %1351 }
 0x8b0   : > { %v1362_v36 = vsel %vm667_vm2, %v2509_v40, %v1352_v34 }
 0x8b9   : > { %v1933_v22 = vpop.eup %1932 }
 0x8ba   : > { %v1266_v23 = vsel %vm747_vm3, %v1933_v22, 0.0 }
 0x8bb   : > { %1267 = vadd.xlane.f32.xlu1 %v1266_v23 }
 0x8cc   : > { %1271 = vrot.lane.b32.xlu1 %v2491_v25, %s2206_s19  ;;  %v1367_v25 = vld [vmem:[#allocation13 + $0x8] sm:$0xff] }
 0x8d0   : > { %1355 = vrot.lane.b32.xlu1 %v1174_v13, %s2208_s16 }
 0x944   : > { %v1268_v24 = vpop.xlane.xlu1 %1267 }
 0x945   : > { %1934 = vrcp.f32 %v1268_v24 }
 0x948   : > { %v1272_v26 = vpop.permute.xlu1 %1271 }
 0x949   : > { %1787 = vmatpush3.msra.mxu0 %v1272_v26 }
 0x94a   : > { %1791 = vmatprep.subr.mxu0 %v2202_v8 }
 0x94c   : > { %v1356_v35 = vpop.permute.xlu1 %1355 }
 0x94d   : > { %v1363_v37 = vsel %vm747_vm3, %v1362_v36, %v1356_v35 }
 0x952   : > { %v1935_v27 = vpop.eup %1934 }
 0x953   : > { %v1270_v28 = vmul.f32 %v1935_v27, %v1933_v22 }
 0x955   : > { %1789 = vmatmul.mubr.msk.f32.vlgmr.msra.gmra.mxu0 %vm747_vm3, %v1270_v28 }
 0x956   : > { %1799 = vmatprep.mubr.msk.f32.mxu0 %vm2203_vm1, %v2202_v8  ;;  %1792 = vmatpush3.msra.mxu0 %v1369_v29 }
 0x957   : > { %1793 = vmatprep.subr.mxu0 %v2202_v8 }
 0x958   : > { %1794 = vmatpush3.msra.mxu0 %v1368_v30 }
 0x959   : > { %1795 = vmatprep.subr.mxu0 %v2202_v8 }
 0x95a   : > { %1796 = vmatpush3.msra.mxu0 %v1367_v25 }
 0x95b   : > { %1797 = vmatprep.subr.mxu0 %v2202_v8 }
 0x95c   : > { %1798 = vmatpush3.msra.mxu0 %v1366_v31 }
 0xa15   : > { %v1346_v32 = vpop.f32.mrf.mxu0 }
 0xa16   : > { %1359 = vrot.lane.b32.xlu0 %v1346_v32, %s2209_s18 }
 0xa17   : > { %v1790_v33 = vpop.f32.mrf.mxu0 }
 0xa88   : > { %v1360_v38 = vpop.permute.xlu0 %1359 }
 0xa89   : > { %v1365_v8 = vsel %vm1364_vm4, %v1363_v37, %v1360_v38 }
 0xa8a   : > { %1800 = vmatmul.mubr.msk.f32.vlgmr.msra.gmra.mxu0 %vm419_vm0, %v1365_v8 }
 0xb4a   : > { %v1446_v41 = vpop.f32.mrf.mxu0 }
 0xb4b   : > { %v1447_v42 = vadd.f32 %v1649_v39, %v1446_v41 }
 0xb4c   : > { %v1801_v40 = vpop.f32.mrf.mxu0 }
 0xb4d   : > { %1450 = vst.msk [vmem:[%s408_s0] sm:$0xff] %vm419_vm0, %v1447_v42 }
 0xb4e   : > { %2109 = shalt.err (!%p2106_p5)
}
 0xb4f   : > { %s2110_s30 = scalar_lea.hbm %s2583_s3, 128  ;;  %s2114_s19 = scalar_lea.hbm %s2633_s7, 256 }
 0xb50   : > { %p2111_p6 = scmp.ne.s32.totalorder %s2583_s3, %s2110_s30  ;;  %p2115_p4 = scmp.lt.s32.totalorder %s2583_s3, %s2633_s7 }
 0xb51   : > { %p2116_p7 = scmp.lt.s32.totalorder %s2114_s19, %s2110_s30 }
 0xb52   : > { %p2112_p13 = pnand %p2111_p6, %p2369_p2 }
 0xb53   : > { %p2117_p1 = por %p2116_p7, %p2115_p4 }
 0xb54   : > { %p2113_p11 = pneg %p2112_p13 }
 0xb56   : > { %p2118_p3 = pnand %p2117_p1, %p2113_p11 }
 0xb58   : > { %2121 = shalt.err (!%p2118_p3)
}
 0xb59   : > { %1822 = dma.vmem_to_hbm [thread:$0]  (%p2369_p2), %s1467_s17, 128, %s2583_s3, %s1452_s5  }
 0xb5a PF: > { %s1478_s18 = sand.u32 1, %s2172_s24   ;;  %p2657_p0 = scmp.ge.s32.totalorder %s2192_s29, 2 }
 0xb5b   : > { %s1479_s4 = scalar_lea.sflag [#allocation6], %s1478_s18 }
 0xb5c   : > { %p1845_p9 = pnand %p2657_p0, %p2376_p8 }
 0xb5e   : > { %p1846_p10 = pneg %p1845_p9 }
 0xb60   : > { %2167 = dma.done.wait (%p1846_p10), %s1479_s4, 128  }
 0xb61   : > { %2169 = vsyncadd (%p1846_p10), %s1479_s4, 4294967168  ;;  %s28_s29 = sadd.s32 1, %s2192_s29   ;;  %s2658_s10 = sld [smem:[#allocation22_spill]] }
 0xb62   : > { %p25_p12 = scmp.ge.s32.totalorder %s28_s29, 4   ;;  %s2659_s24 = smov %s2176_s25 }
 0xb63   : > { %s2660_s25 = smov %s2180_s26  ;;  %s2661_s26 = smov %s2374_s12 }
 0xb64   : > { %s2662_s27 = smov %s2188_s28  ;;  %27 = sbr.rel (!%p25_p12) target bundleno = 16 (0x10), region = 126 }
 0xb67   : > { %s2663_s28 = smov %s2658_s10 }
 0xb69   :  { %1484 = vsyncpa [#allocation5], 1 }
 0xb6a   :  { %1486 = vsyncpa [#allocation5 + $0x1], 1 }
 0xb6b   :  { %1487 = vsyncpa [#allocation8], 1 }
 0xb6c   :  { %1489 = vsyncpa [#allocation8 + $0x1], 1 }
 0xb6d   :  { %1490 = vsyncpa [#allocation11], 1 }
 0xb6e   :  { %1491 = vsyncpa [#allocation14], 1 }
 0xb6f   :  { %1492 = vsyncpa [#allocation6], 1 }
 0xb70   :  { %1494 = vsyncpa [#allocation6 + $0x1], 1 }

</bundles_post_ra>
